<compile_context>
chip_gen: v6e
topology: v6e:2x2x1
jax: 0.10.0
libtpu: 0.0.40
codegen_flags: <defaults>
</compile_context>

<pallas_src>
import functools
import math

import jax
import jax.numpy as jnp
from jax.experimental import pallas as pl
from jax.experimental.pallas import tpu as pltpu


# ----------------------------------------------------------------------------
# Generation-aware tuning knobs
# ----------------------------------------------------------------------------
@functools.lru_cache(maxsize=1)
def _hw_config():
    """Returns (vmem_limit_bytes, tn_cap, tk_cap) based on the TPU generation."""
    vmem_bytes = None
    try:
        info = pltpu.get_tpu_info()
        vmem_bytes = getattr(info, "vmem_capacity_bytes", None)
    except Exception:
        vmem_bytes = None
    if vmem_bytes is None:
        # Unknown: assume the tighter (v7x-like, 64 MiB) budget.
        vmem_bytes = 64 * 1024 * 1024
    if vmem_bytes >= 100 * 1024 * 1024:
        # v5e / v6e: 128 MiB physical VMEM -> larger streaming tiles.
        return 96 * 1024 * 1024, 1024, 1024
    # v7x: 64 MiB per TensorCore -> stay conservative, keep double-buffer room.
    return 44 * 1024 * 1024, 512, 512


def _sublane_align(dtype) -> int:
    """Sublane tile for a dtype: 8 for f32, 16 for bf16, 32 for 8-bit."""
    itemsize = jnp.dtype(dtype).itemsize
    return max(8, 32 // max(itemsize, 1))


def _pick_tile(full: int, cap: int, align: int) -> int:
    """Largest tile <= cap that divides `full`, preferring multiples of `align`.

    Falls back to `full` (single block along that axis) when no aligned divisor
    exists, which always satisfies the (8,128) BlockSpec rule.
    """
    if full <= cap:
        return full
    t = (cap // align) * align
    while t >= align:
        if full % t == 0:
            return t
        t -= align
    return full


# ----------------------------------------------------------------------------
# Tiled linear:  y = x @ W   with W pre-transposed at init to (K, N)
# ----------------------------------------------------------------------------
def _linear_kernel(x_ref, w_ref, o_ref, acc_ref):
    @pl.when(pl.program_id(2) == 0)
    def _():
        acc_ref[...] = jnp.zeros(acc_ref.shape, acc_ref.dtype)

    # x_ref: (tm, tk), w_ref: (tk, tn) -> canonical MXU contraction.
    acc_ref[...] += jnp.dot(
        x_ref[...], w_ref[...], preferred_element_type=jnp.float32
    )

    @pl.when(pl.program_id(2) == pl.num_programs(2) - 1)
    def _():
        o_ref[...] = acc_ref[...].astype(o_ref.dtype)


def linear_pallas(x2d, w_t, *, tm_cap=256, tn_cap=None, tk_cap=None):
    """x2d: (M, K), w_t: (K, N) pre-transposed weight -> (M, N)."""
    vmem_limit, cap_n, cap_k = _hw_config()
    tn_cap = cap_n if tn_cap is None else tn_cap
    tk_cap = cap_k if tk_cap is None else tk_cap
    M, K = x2d.shape
    K2, N = w_t.shape
    assert K == K2
    tm = _pick_tile(M, tm_cap, align=_sublane_align(x2d.dtype))
    tn = _pick_tile(N, tn_cap, align=128)
    tk = _pick_tile(K, tk_cap, align=128)
    grid = (M // tm, N // tn, K // tk)
    return pl.pallas_call(
        _linear_kernel,
        out_shape=jax.ShapeDtypeStruct((M, N), x2d.dtype),
        grid=grid,
        in_specs=[
            pl.BlockSpec((tm, tk), lambda i, j, k: (i, k)),
            pl.BlockSpec((tk, tn), lambda i, j, k: (k, j)),
        ],
        out_specs=pl.BlockSpec((tm, tn), lambda i, j, k: (i, j)),
        scratch_shapes=[pltpu.VMEM((tm, tn), jnp.float32)],
        compiler_params=pltpu.CompilerParams(
            dimension_semantics=("parallel", "parallel", "arbitrary"),
            vmem_limit_bytes=vmem_limit,
        ),
    )(x2d, w_t)


# ----------------------------------------------------------------------------
# Flash SDPA, tiled over q rows and the KV axis, GQA folded into the q rows.
# The softmax scale is pre-folded into wq, so scores are used as-is.
# ----------------------------------------------------------------------------
def _flash_sdpa_kernel(q_ref, k_ref, v_ref, mask_ref, o_ref,
                       m_sc, l_sc, acc_sc, *, reps_in_block):
    t = pl.program_id(2)

    @pl.when(t == 0)
    def _():
        m_sc[...] = jnp.full(m_sc.shape, -jnp.inf, m_sc.dtype)
        l_sc[...] = jnp.zeros(l_sc.shape, l_sc.dtype)
        acc_sc[...] = jnp.zeros(acc_sc.shape, acc_sc.dtype)

    q = q_ref[0]          # (tq, D)  native dtype for the MXU
    k = k_ref[0]          # (tkv, D)
    v = v_ref[0]          # (tkv, D)

    # scores = q @ k^T (scale already folded into wq), f32 accumulation.
    s = jax.lax.dot_general(
        q, k, (((1,), (1,)), ((), ())), preferred_element_type=jnp.float32
    )                                                     # (tq, tkv)
    mask = mask_ref[...].astype(jnp.float32)              # (tq//reps, tkv)
    if reps_in_block > 1:
        # Decode-only path: tq is small (n_rep * seqlen), so this expansion is
        # negligible.  Prefill-sized q blocks never take this branch.
        mask = jnp.tile(mask, (reps_in_block, 1))
    s = s + mask

    m_prev = m_sc[...]
    m_new = jnp.maximum(m_prev, jnp.max(s, axis=-1, keepdims=True))
    alpha = jnp.exp(m_prev - m_new)
    p = jnp.exp(s - m_new)
    l_sc[...] = alpha * l_sc[...] + jnp.sum(p, axis=-1, keepdims=True)
    acc_sc[...] = alpha * acc_sc[...] + jnp.dot(
        p.astype(v.dtype), v, preferred_element_type=jnp.float32
    )
    m_sc[...] = m_new

    @pl.when(t == pl.num_programs(2) - 1)
    def _():
        # Exact reciprocal: runs once per (b, q-block), cost negligible.
        inv_l = pl.reciprocal(l_sc[...], approx=False)
        o_ref[0] = (acc_sc[...] * inv_l).astype(o_ref.dtype)


def sdpa_flash_pallas(q_g, k_f, v_f, mask, *, n_rep,
                      q_tile_cap=256, kv_tile_cap=512):
    """q_g: (B*n_kv, G, D) rows ordered (rep, s); k_f/v_f: (B*n_kv, T, D);
    mask: (S, T) additive."""
    vmem_limit, _, _ = _hw_config()
    BG, G, D = q_g.shape
    T = k_f.shape[1]
    S = mask.shape[0]
    assert G == n_rep * S

    if G <= q_tile_cap:
        # Decode path: one q block per kv head -> KV DMA'd exactly once.
        tq = G
        reps_in_block = n_rep
        n_s_blocks = 1
    else:
        # Prefill path: tile q rows within a rep; each block's mask slice is
        # addressed directly through the BlockSpec index_map (no expansion).
        tq = _pick_tile(S, q_tile_cap, align=_sublane_align(q_g.dtype))
        reps_in_block = 1
        n_s_blocks = S // tq
    mask_rows = tq // reps_in_block
    tkv = _pick_tile(T, kv_tile_cap, align=128)
    grid = (BG, G // tq, T // tkv)

    if n_s_blocks > 1:
        mask_idx = lambda b, j, t: (j % n_s_blocks, t)
    else:
        mask_idx = lambda b, j, t: (0, t)

    kernel = functools.partial(_flash_sdpa_kernel, reps_in_block=reps_in_block)
    return pl.pallas_call(
        kernel,
        out_shape=jax.ShapeDtypeStruct((BG, G, D), q_g.dtype),
        grid=grid,
        in_specs=[
            pl.BlockSpec((1, tq, D), lambda b, j, t: (b, j, 0)),
            pl.BlockSpec((1, tkv, D), lambda b, j, t: (b, t, 0)),
            pl.BlockSpec((1, tkv, D), lambda b, j, t: (b, t, 0)),
            pl.BlockSpec((mask_rows, tkv), mask_idx),
        ],
        out_specs=pl.BlockSpec((1, tq, D), lambda b, j, t: (b, j, 0)),
        scratch_shapes=[
            pltpu.VMEM((tq, 1), jnp.float32),   # running max
            pltpu.VMEM((tq, 1), jnp.float32),   # running sum
            pltpu.VMEM((tq, D), jnp.float32),   # running accumulator
        ],
        compiler_params=pltpu.CompilerParams(
            dimension_semantics=("parallel", "parallel", "arbitrary"),
            vmem_limit_bytes=vmem_limit,
        ),
    )(q_g, k_f, v_f, mask)


# ----------------------------------------------------------------------------
# Glue (plain JAX): weight prep, RoPE (elementwise), reshapes, cache concat
# ----------------------------------------------------------------------------
def prepare_attention_params(params, *, head_dim, dtype=None):
    """One-time weight prep: fuse wq/wk/wv along the output dim, fold the
    1/sqrt(head_dim) softmax scale into wq (exact: RoPE is a rotation), and
    pre-transpose everything to (K, N) so the GEMM kernel never transposes."""
    scale = 1.0 / math.sqrt(head_dim)
    wqkv = jnp.concatenate(
        [params["wq"] * scale, params["wk"], params["wv"]], axis=0)   # (Nq+2Nk, dim)
    wqkv_t = jnp.transpose(wqkv)          # (dim, Nq+2Nk)
    wo_t = jnp.transpose(params["wo"])    # (n_heads*head_dim, dim)
    if dtype is not None:
        wqkv_t = wqkv_t.astype(dtype)
        wo_t = wo_t.astype(dtype)
    return {"wqkv_t": wqkv_t, "wo_t": wo_t}


def apply_rotary_emb(x, cos, sin):
    """x: (B, S, H, D) interleaved real/imag pairs, cos/sin: (S, D//2)."""
    # TODO(synk): fuse the rotation into the fused QKV projection epilogue so
    # q/k never make an extra HBM round trip; the interleaved-pair rotation is
    # not a clean pltpu.roll half-rotation, so it stays in plain JAX here.
    xr = x.reshape(x.shape[:-1] + (-1, 2))
    x_r, x_i = xr[..., 0], xr[..., 1]
    c = cos[None, :, None, :]
    s = sin[None, :, None, :]
    o_r = x_r * c - x_i * s
    o_i = x_r * s + x_i * c
    return jnp.stack([o_r, o_i], axis=-1).reshape(x.shape)


def attention_forward(prepared, x, freqs_cos, freqs_sin, k_cache, v_cache,
                      attn_mask, *, n_heads, n_kv_heads, head_dim):
    """Mirror of Attention.forward. Returns (output, new_k, new_v)."""
    bsz, seqlen, dim = x.shape
    n_rep = n_heads // n_kv_heads
    nq = n_heads * head_dim
    nk = n_kv_heads * head_dim

    # Fused QKV projection: x streamed from HBM once.
    x2d = x.reshape(bsz * seqlen, dim)
    qkv = linear_pallas(x2d, prepared["wqkv_t"])
    q = qkv[:, :nq].reshape(bsz, seqlen, n_heads, head_dim)
    k = qkv[:, nq:nq + nk].reshape(bsz, seqlen, n_kv_heads, head_dim)
    v = qkv[:, nq + nk:].reshape(bsz, seqlen, n_kv_heads, head_dim)

    q = apply_rotary_emb(q, freqs_cos, freqs_sin)
    k = apply_rotary_emb(k, freqs_cos, freqs_sin)

    q = jnp.transpose(q, (0, 2, 1, 3))  # (B, H,   S, D)
    k = jnp.transpose(k, (0, 2, 1, 3))  # (B, Hkv, S, D)
    v = jnp.transpose(v, (0, 2, 1, 3))
    new_k, new_v = k, v

    # TODO(synk): a production decode loop should update a preallocated KV
    # cache in place (lax.dynamic_update_slice / input_output_aliases) and
    # pass the valid length as a scalar-prefetch arg; the module's forward
    # concatenates, so its semantics are preserved here.
    k_full = jnp.concatenate([k_cache, k], axis=2)  # (B, Hkv, T, D)
    v_full = jnp.concatenate([v_cache, v], axis=2)
    T = k_full.shape[2]

    # GQA fold: q heads sharing a KV head merged into the row dimension
    # (row = rep * seqlen + s), so the KV cache is never repeated.
    G = n_rep * seqlen
    q_g = q.reshape(bsz, n_kv_heads, n_rep, seqlen, head_dim)
    q_g = q_g.reshape(bsz * n_kv_heads, G, head_dim)
    k_f = k_full.reshape(bsz * n_kv_heads, T, head_dim)
    v_f = v_full.reshape(bsz * n_kv_heads, T, head_dim)

    out = sdpa_flash_pallas(q_g, k_f, v_f, attn_mask, n_rep=n_rep)

    out = out.reshape(bsz, n_kv_heads, n_rep, seqlen, head_dim)
    out = jnp.transpose(out, (0, 3, 1, 2, 4)).reshape(bsz, seqlen, nq)
    out = linear_pallas(out.reshape(bsz * seqlen, nq),
                        prepared["wo_t"]).reshape(bsz, seqlen, dim)
    return out, new_k, new_v


# ----------------------------------------------------------------------------
# Pure-JAX reference for verification (uses raw torch-layout weights)
# ----------------------------------------------------------------------------
def attention_reference(params, x, freqs_cos, freqs_sin, k_cache, v_cache,
                        attn_mask, *, n_heads, n_kv_heads, head_dim):
    bsz, seqlen, dim = x.shape
    q = (x @ params["wq"].T).reshape(bsz, seqlen, n_heads, head_dim)
    k = (x @ params["wk"].T).reshape(bsz, seqlen, n_kv_heads, head_dim)
    v = (x @ params["wv"].T).reshape(bsz, seqlen, n_kv_heads, head_dim)
    q = apply_rotary_emb(q, freqs_cos, freqs_sin)
    k = apply_rotary_emb(k, freqs_cos, freqs_sin)
    q = jnp.transpose(q, (0, 2, 1, 3))
    k = jnp.transpose(k, (0, 2, 1, 3))
    v = jnp.transpose(v, (0, 2, 1, 3))
    k_full = jnp.concatenate([k_cache, k], axis=2)
    v_full = jnp.concatenate([v_cache, v], axis=2)
    n_rep = n_heads // n_kv_heads
    if n_rep > 1:
        k_full = jnp.repeat(k_full, n_rep, axis=1)
        v_full = jnp.repeat(v_full, n_rep, axis=1)
    s = jnp.einsum("bhqd,bhkd->bhqk", q, k_full) / math.sqrt(head_dim)
    s = s + attn_mask[None, None]
    p = jax.nn.softmax(s, axis=-1)
    o = jnp.einsum("bhqk,bhkd->bhqd", p, v_full)
    o = jnp.transpose(o, (0, 2, 1, 3)).reshape(bsz, seqlen, n_heads * head_dim)
    return o @ params["wo"].T


# ----------------------------------------------------------------------------
# Main
# ----------------------------------------------------------------------------
if __name__ == "__main__":
    # Small shapes consistent with the module (ModelArgs scaled down).
    # n_kv_heads < n_heads so the GQA (no-repeat) path is exercised.
    bsz, seqlen, dim = 2, 8, 32
    n_heads, n_kv_heads = 4, 2            # n_rep = 2
    head_dim = dim // n_heads             # 8
    cache_len = 8                         # existing KV cache entries
    rope_base = 10000.0

    key = jax.random.PRNGKey(0)
    k0, k1, k2, k3, k4, k5, k6 = jax.random.split(key, 7)

    params = {
        "wq": 0.02 * jax.random.normal(k0, (n_heads * head_dim, dim), jnp.float32),
        "wk": 0.02 * jax.random.normal(k1, (n_kv_heads * head_dim, dim), jnp.float32),
        "wv": 0.02 * jax.random.normal(k2, (n_kv_heads * head_dim, dim), jnp.float32),
        "wo": 0.02 * jax.random.normal(k3, (dim, n_heads * head_dim), jnp.float32),
    }

    x = jax.random.normal(k4, (bsz, seqlen, dim), jnp.float32)
    k_cache = jax.random.normal(k5, (bsz, n_kv_heads, cache_len, head_dim), jnp.float32)
    v_cache = jax.random.normal(k6, (bsz, n_kv_heads, cache_len, head_dim), jnp.float32)

    # RoPE frequencies for positions [cache_len, cache_len + seqlen)
    # TODO(synk): use_scaled_rope frequency rescaling omitted; freqs are an
    # input to forward(), so attention semantics are unchanged.
    inv_freq = 1.0 / (rope_base ** (jnp.arange(0, head_dim, 2, dtype=jnp.float32) / head_dim))
    t = jnp.arange(cache_len, cache_len + seqlen, dtype=jnp.float32)
    freqs = jnp.outer(t, inv_freq)                       # (S, D//2)
    freqs_cos = jnp.cos(freqs)
    freqs_sin = jnp.sin(freqs)

    # Additive causal mask: cache positions fully visible, new tokens causal.
    T = cache_len + seqlen
    q_pos = cache_len + jnp.arange(seqlen)[:, None]
    k_pos = jnp.arange(T)[None, :]
    attn_mask = jnp.where(k_pos <= q_pos, 0.0, -1e30).astype(jnp.float32)  # (S, T)

    prepared = prepare_attention_params(params, head_dim=head_dim)

    out, new_k, new_v = attention_forward(
        prepared, x, freqs_cos, freqs_sin, k_cache, v_cache, attn_mask,
        n_heads=n_heads, n_kv_heads=n_kv_heads, head_dim=head_dim)
    jax.block_until_ready((out, new_k, new_v))

    ref = attention_reference(
        params, x, freqs_cos, freqs_sin, k_cache, v_cache, attn_mask,
        n_heads=n_heads, n_kv_heads=n_kv_heads, head_dim=head_dim)
    assert out.shape == (bsz, seqlen, dim)
    assert new_k.shape == (bsz, n_kv_heads, seqlen, head_dim)
    assert jnp.max(jnp.abs(out - ref)) < 1e-3

    # Also exercise the tiled-q (prefill) SDPA path by forcing a small q tile
    # and checking it matches the single-block (decode) path.
    n_rep = n_heads // n_kv_heads
    G = n_rep * seqlen
    q_ref_in = jax.random.normal(jax.random.PRNGKey(7),
                                 (bsz * n_kv_heads, G, head_dim), jnp.float32)
    k_f = jnp.concatenate(
        [k_cache, jnp.zeros((bsz, n_kv_heads, seqlen, head_dim), jnp.float32)],
        axis=2).reshape(bsz * n_kv_heads, T, head_dim)
    v_f = jnp.concatenate(
        [v_cache, jnp.zeros((bsz, n_kv_heads, seqlen, head_dim), jnp.float32)],
        axis=2).reshape(bsz * n_kv_heads, T, head_dim)
    o_single = sdpa_flash_pallas(q_ref_in, k_f, v_f, attn_mask, n_rep=n_rep)
    o_tiled = sdpa_flash_pallas(q_ref_in, k_f, v_f, attn_mask, n_rep=n_rep,
                                q_tile_cap=seqlen)   # forces G//tq > 1
    jax.block_until_ready((o_single, o_tiled))
    assert jnp.max(jnp.abs(o_single - o_tiled)) < 1e-5

    print("KERNEL_OK")
</pallas_src>

<mosaic_0001>
module attributes {stable_mosaic.version = 11 : i64} {
  func.func @_linear_kernel(%arg0: i32, %arg1: i32, %arg2: i32, %arg3: memref<16x32xf32, #tpu.memory_space<vmem>>, %arg4: memref<32x64xf32, #tpu.memory_space<vmem>>, %arg5: memref<16x64xf32, #tpu.memory_space<vmem>>, %arg6: memref<16x64xf32, #tpu.memory_space<vmem>>) attributes {dimension_semantics = [#tpu.dimension_semantics<parallel>, #tpu.dimension_semantics<parallel>, #tpu.dimension_semantics<arbitrary>], iteration_bounds = array<i64: 1, 1, 1>, scalar_prefetch = 0 : i64, scratch_operands = 1 : i64, tpu.core_type = #tpu.core_type<tc>, window_params = [{transform_indices = @transform_0, window_bounds = array<i64: 16, 32>}, {transform_indices = @transform_1, window_bounds = array<i64: 32, 64>}, {transform_indices = @transform_2, window_bounds = array<i64: 16, 64>}]} {
    %c0_i32 = arith.constant 0 : i32
    %0 = arith.cmpi eq, %arg2, %c0_i32 : i32
    %1 = arith.extui %0 : i1 to i32
    %c0_i32_0 = arith.constant 0 : i32
    %2 = arith.cmpi ne, %1, %c0_i32_0 : i32
    scf.if %2 {
      %cst_10 = arith.constant 0.000000e+00 : f32
      %12 = vector.broadcast %cst_10 : f32 to vector<16x64xf32>
      %c0_11 = arith.constant 0 : index
      %c0_12 = arith.constant 0 : index
      %13 = vector.load %arg6[%c0_11, %c0_12] : memref<16x64xf32, #tpu.memory_space<vmem>>, vector<16x64xf32>
      tpu.vector_store %arg6[%c0_11, %c0_12], %12 {strides = array<i32>} : memref<16x64xf32, #tpu.memory_space<vmem>>, vector<16x64xf32>,
    } else {
    }
    %c0 = arith.constant 0 : index
    %c0_1 = arith.constant 0 : index
    %3 = vector.load %arg6[%c0, %c0_1] : memref<16x64xf32, #tpu.memory_space<vmem>>, vector<16x64xf32>
    %c0_2 = arith.constant 0 : index
    %c0_3 = arith.constant 0 : index
    %4 = vector.load %arg3[%c0_2, %c0_3] : memref<16x32xf32, #tpu.memory_space<vmem>>, vector<16x32xf32>
    %c0_4 = arith.constant 0 : index
    %c0_5 = arith.constant 0 : index
    %5 = vector.load %arg4[%c0_4, %c0_5] : memref<32x64xf32, #tpu.memory_space<vmem>>, vector<32x64xf32>
    %cst = arith.constant dense<0.000000e+00> : vector<16x64xf32>
    %6 = tpu.matmul %4, %5, %cst {dimension_numbers = #tpu.dot_dimension_numbers<[1], [0], [0], [1], [0, 0, 1, 1], [], []>} : vector<16x32xf32>, vector<32x64xf32>, vector<16x64xf32> -> vector<16x64xf32>
    %7 = arith.addf %3, %6 : vector<16x64xf32>
    %c0_6 = arith.constant 0 : index
    %c0_7 = arith.constant 0 : index
    %8 = vector.load %arg6[%c0_6, %c0_7] : memref<16x64xf32, #tpu.memory_space<vmem>>, vector<16x64xf32>
    tpu.vector_store %arg6[%c0_6, %c0_7], %7 {strides = array<i32>} : memref<16x64xf32, #tpu.memory_space<vmem>>, vector<16x64xf32>,
    %c0_i32_8 = arith.constant 0 : i32
    %9 = arith.cmpi eq, %arg2, %c0_i32_8 : i32
    %10 = arith.extui %9 : i1 to i32
    %c0_i32_9 = arith.constant 0 : i32
    %11 = arith.cmpi ne, %10, %c0_i32_9 : i32
    scf.if %11 {
      %c0_10 = arith.constant 0 : index
      %c0_11 = arith.constant 0 : index
      %12 = vector.load %arg6[%c0_10, %c0_11] : memref<16x64xf32, #tpu.memory_space<vmem>>, vector<16x64xf32>
      %c0_12 = arith.constant 0 : index
      %c0_13 = arith.constant 0 : index
      %13 = vector.load %arg5[%c0_12, %c0_13] : memref<16x64xf32, #tpu.memory_space<vmem>>, vector<16x64xf32>
      tpu.vector_store %arg5[%c0_12, %c0_13], %12 {strides = array<i32>} : memref<16x64xf32, #tpu.memory_space<vmem>>, vector<16x64xf32>,
    } else {
    }
    return
  }
  func.func @transform_0(%arg0: i32, %arg1: i32, %arg2: i32) -> (i32, i32) {
    %c0_i32 = arith.constant 0 : i32
    return %arg0, %arg2 : i32, i32
  }
  func.func @transform_1(%arg0: i32, %arg1: i32, %arg2: i32) -> (i32, i32) {
    %c0_i32 = arith.constant 0 : i32
    return %arg2, %arg1 : i32, i32
  }
  func.func @transform_2(%arg0: i32, %arg1: i32, %arg2: i32) -> (i32, i32) {
    %c0_i32 = arith.constant 0 : i32
    return %arg0, %arg1 : i32, i32
  }
}

</mosaic_0001>

<bundles_post_ra>
// kernel: tpu_custom_call.1
= control target key start
LH: loop header
LB: loop body
LE: loop exit
PB: predicated region body
PF: predicated region fallthrough
CT: control target
= control target key end

     0   :  { %7 = vsyncpa [#allocation4], 0  ;;  %s305_s0 = inlined_call_operand.hbm [shape: f32[16,32], index: 0, kind: input, shape index: {}]   ;;  %s306_s1 = inlined_call_operand.hbm [shape: f32[32,64], index: 1, kind: input, shape index: {}]   ;;  %s307_s2 = inlined_call_operand.hbm [shape: f32[16,64], index: 2, kind: output, shape index: {}]  }
   0x1   :  { %8 = vsyncpa [#allocation7], 0 }
   0x2   :  { %9 = vsyncpa [#allocation5], 0  ;;  %s258_s9 = smov [#allocation3]  }
   0x3   :  { %s15_s10 = sshll.u32 %s258_s9, 4  ;;  %s16_s10 = int_to_ptr.vmem [resolvable:$true] %s15_s10 }
   0x4   :  { %s200_s11 = scalar_lea.vmem %s16_s10, 256  ;;  %p205_p1 = scmp.lt.s32.totalorder %s16_s10, %s16_s10 }
   0x5   :  { %p201_p0 = scmp.ne.s32.totalorder %s16_s10, %s200_s11  ;;  %p206_p2 = scmp.lt.s32.totalorder %s200_s11, %s200_s11 }
   0x7   :  { %p207_p3 = por %p206_p2, %p205_p1 }
   0x9   :  { %p208_p4 = pnand %p207_p3, %p201_p0 }
   0xb   :  { %211 = shalt.err (!%p208_p4)
}
   0xc   :  { %s259_s12 = smov 128   ;;  %s260_s13 = smov 8  }
   0xd   :  { %21 = dma.hbm_to_vmem [thread:$0]  %s305_s0, 256, %s16_s10, [#allocation4], %s259_s12, %s259_s12, %s260_s13  }
   0xe   :  { %s261_s16 = smov [#allocation6]  }
   0xf   :  { %s27_s17 = sshll.u32 %s261_s16, 4  ;;  %s28_s17 = int_to_ptr.vmem [resolvable:$true] %s27_s17 }
  0x10   :  { %s220_s18 = scalar_lea.vmem %s28_s17, 512  ;;  %p225_p6 = scmp.lt.s32.totalorder %s28_s17, %s28_s17 }
  0x11   :  { %p221_p5 = scmp.ne.s32.totalorder %s28_s17, %s220_s18  ;;  %p226_p7 = scmp.lt.s32.totalorder %s220_s18, %s220_s18 }
  0x13   :  { %p227_p8 = por %p226_p7, %p225_p6 }
  0x15   :  { %p228_p9 = pnand %p227_p8, %p221_p5 }
  0x17   :  { %231 = shalt.err (!%p228_p9)
}
  0x18   :  { %33 = dma.hbm_to_vmem [thread:$0]  %s306_s1, 512, %s28_s17, [#allocation7], %s259_s12, %s259_s12, %s260_s13  }
  0x19   :  { %252 = dma.done.wait [#allocation4], 256  }
  0x1a   :  { %253 = vsyncadd [#allocation4], 4294967040 }
  0x1b   :  { %254 = dma.done.wait [#allocation7], 512  }
  0x1c   :  { %255 = vsyncadd [#allocation7], 4294966784  ;;  %vm44_vm0 = vcmask 523264   ;;  %v262_v0 = vmov 0.0   ;;  %vm55_vm1 = vcmask 261120   ;;  %v54_v1 = vld [vmem:[#allocation6 + $0x18] sm:$0xff] }
  0x1d   :  { %46 = vst.msk [vmem:[#allocation2 + $0x8] sm:$0xff] %vm44_vm0, %v262_v0  ;;  %45 = vst.msk [vmem:[#allocation2] sm:$0xff] %vm44_vm0, %v262_v0  ;;  %v53_v2 = vld [vmem:[#allocation6 + $0x10] sm:$0xff]  ;;  %175 = vmatprep.subr.mxu0 %v54_v1  ;;  %v52_v4 = vld [vmem:[#allocation6 + $0x8] sm:$0xff]  ;;  %s263_s0 = smov [#allocation8]  }
  0x1e   :  { %v49_v3 = vld [vmem:[#allocation3] sm:$0xff]  ;;  %176 = vmatpush3.msra.mxu0 %v54_v1  ;;  %v51_v5 = vld [vmem:[#allocation6] sm:$0xff]  ;;  %v50_v6 = vld [vmem:[#allocation3 + $0x8] sm:$0xff]  ;;  %s154_s1 = sshll.u32 %s263_s0, 4  ;;  %s155_s1 = int_to_ptr.vmem [resolvable:$true] %s154_s1 }
  0x1f   :  { %183 = vmatprep.mubr.msk.f32.mxu0 %vm55_vm1, %v49_v3  ;;  %177 = vmatprep.subr.mxu0 %v53_v2  ;;  %s232_s21 = scalar_lea.vmem %s155_s1, 256  ;;  %p237_p11 = scmp.lt.s32.totalorder %s155_s1, %s155_s1 }
  0x20   :  { %178 = vmatpush3.msra.mxu0 %v53_v2  ;;  %p233_p10 = scmp.ne.s32.totalorder %s155_s1, %s232_s21  ;;  %p238_p12 = scmp.lt.s32.totalorder %s232_s21, %s232_s21 }
  0x21   :  { %179 = vmatprep.subr.mxu0 %v52_v4 }
  0x22   :  { %180 = vmatpush3.msra.mxu0 %v52_v4  ;;  %p239_p13 = por %p238_p12, %p237_p11 }
  0x23   :  { %181 = vmatprep.subr.mxu0 %v51_v5 }
  0x24   :  { %182 = vmatpush3.msra.mxu0 %v51_v5  ;;  %v48_v7 = vld [vmem:[#allocation2 + $0x8] sm:$0xff]  ;;  %v47_v9 = vld [vmem:[#allocation2] sm:$0xff]  ;;  %p240_p0 = pnand %p239_p13, %p233_p10 }
  0x25   :  { %184 = vmatmul.mubr.msk.f32.vlgmr.msra.gmra.mxu0 %vm55_vm1, %v50_v6 }
  0xe5   :  { %v185_v8 = vpop.f32.mrf.mxu0 }
  0xe6   :  { %v138_v10 = vadd.f32 %v185_v8, %v48_v7 }
  0xe7   :  { %v128_v11 = vpop.f32.mrf.mxu0 }
  0xe8   :  { %141 = vst.msk [vmem:[#allocation2 + $0x8] sm:$0xff] %vm44_vm0, %v138_v10  ;;  %v137_v12 = vadd.f32 %v128_v11, %v47_v9 }
  0xea   :  { %140 = vst.msk [vmem:[#allocation2] sm:$0xff] %vm44_vm0, %v137_v12 }
  0xef   :  { %v146_v13 = vld [vmem:[#allocation2 + $0x8] sm:$0xff] }
  0xf0   :  { %148 = vst.msk [vmem:[#allocation8 + $0x8] sm:$0xff] %vm44_vm0, %v146_v13 }
  0xf1   :  { %v145_v14 = vld [vmem:[#allocation2] sm:$0xff] }
  0xf2   :  { %147 = vst.msk [vmem:[#allocation8] sm:$0xff] %vm44_vm0, %v145_v14 }
  0xf3   :  { %243 = shalt.err (!%p240_p0)
}
  0xf4   :  { %160 = dma.vmem_to_hbm [thread:$0]  %s155_s1, 256, %s307_s2, [#allocation5], %s259_s12, %s259_s12, %s260_s13  }
  0xf5   :  { %256 = dma.done.wait [#allocation5], 256  }
  0xf6   :  { %257 = vsyncadd [#allocation5], 4294967040 }
  0xf7   :  { %164 = vsyncpa [#allocation4], 1 }
  0xf8   :  { %165 = vsyncpa [#allocation7], 1 }
  0xf9   :  { %166 = vsyncpa [#allocation5], 1 }

</bundles_post_ra>
